<compile_context>
chip_gen: v5e
topology: v5e:2x2
jax: 0.10.0
libtpu: 0.0.40
codegen_flags: <defaults>
</compile_context>

<pallas_src>
import functools

import jax
import jax.numpy as jnp
from jax.experimental import pallas as pl
from jax.experimental.pallas import tpu as pltpu

BN_EPS = 1e-5


def _round_up(v, m):
    return (v + m - 1) // m * m


def _vmem_capacity_bytes():
    """Physical VMEM of the current TPU generation (fallback: v7x-sized)."""
    try:
        return int(pltpu.get_tpu_info().vmem_capacity_bytes)
    except Exception:  # no TPU info available at trace time
        return 64 * 1024 * 1024


# --------------------------------------------------------------------------
# Kernels
# --------------------------------------------------------------------------

def convt_stats_kernel_1k(w_ref, p_ref, y_ref, sum_ref, ssq_ref):
    """Single-K-step path: one matmul per (phase, M-tile) output tile.

    w_ref:   (Cpad, Kpad) bf16  per-phase weights, VMEM-resident across i
    p_ref:   (Kpad, TM)   bf16  per-phase im2col patches (K-major)
    y_ref:   (Cpad, TM)   bf16  conv output tile (channels x output pixels)
    sum_ref: (Cpad, 1)    f32   per-channel partial sum for this tile
    ssq_ref: (Cpad, 1)    f32   per-channel partial sum of squares
    """
    y = jnp.dot(w_ref[...], p_ref[...], preferred_element_type=jnp.float32)
    y_ref[...] = y.astype(y_ref.dtype)
    # Stats from the f32 accumulation (before the bf16 downcast).
    sum_ref[...] = jnp.sum(y, axis=1, keepdims=True)
    ssq_ref[...] = jnp.sum(y * y, axis=1, keepdims=True)


def convt_stats_kernel_mk(tk, resident_w,
                          w_ref, p_ref, y_ref, sum_ref, ssq_ref, acc_ref):
    """Large-K fallback: K grid axis + f32 VMEM accumulator (y is bf16, so the
    accumulator cannot live in y_ref without losing precision)."""
    k = pl.program_id(2)

    @pl.when(k == 0)
    def _init():
        acc_ref[...] = jnp.zeros_like(acc_ref)

    if resident_w:
        koff = pl.multiple_of(k * tk, tk)
        w_blk = w_ref[:, pl.ds(koff, tk)]
    else:
        w_blk = w_ref[...]
    acc_ref[...] += jnp.dot(w_blk, p_ref[...],
                            preferred_element_type=jnp.float32)

    @pl.when(k == pl.num_programs(2) - 1)
    def _finalize():
        y = acc_ref[...]
        y_ref[...] = y.astype(y_ref.dtype)
        sum_ref[...] = jnp.sum(y, axis=1, keepdims=True)
        ssq_ref[...] = jnp.sum(y * y, axis=1, keepdims=True)


# --------------------------------------------------------------------------
# Wrapper-side phase decomposition
# --------------------------------------------------------------------------

# Taps used by each output-row parity r (columns are analogous with parity c).
# oh = 2*a + r needs kernel rows kh with kh = oh + 1 - 2*ih:
#   r=0 -> kh in {1, 3},  r=1 -> kh in {0, 2}.
# The second entry of each pair is the row offset of that tap into the
# 1-pixel zero-padded input when sliding over a = 0..H-1.
_PARITY_TAPS = {0: ((1, 1), (3, 0)), 1: ((0, 2), (2, 1))}


def _phase_decompose(x, w):
    """Build per-phase K-major patch and weight matrices (in x/w's dtype).

    x: (N, Cin, H, W)    -> patches_t: (4, Cin*4, N*H*W)
    w: (Cin, Cout, 4, 4) -> weights_t: (4, Cout, Cin*4)
    Phase index p = 2*(oh % 2) + (ow % 2).
    """
    n, cin, h, wd = x.shape
    cout = w.shape[1]
    xp = jnp.pad(x, ((0, 0), (0, 0), (1, 1), (1, 1)))
    patches, weights = [], []
    for r in range(2):
        for c in range(2):
            taps_x, taps_w = [], []
            for kh, hs in _PARITY_TAPS[r]:
                for kw, ws in _PARITY_TAPS[c]:
                    taps_x.append(xp[:, :, hs:hs + h, ws:ws + wd])  # (N,Cin,H,W)
                    taps_w.append(w[:, :, kh, kw])                  # (Cin,Cout)
            pt = jnp.stack(taps_x, axis=0)            # (4, N, Cin, H, W)
            pt = pt.transpose(2, 0, 1, 3, 4)          # (Cin, 4, N, H, W)
            patches.append(pt.reshape(cin * 4, n * h * wd))
            wt = jnp.stack(taps_w, axis=1)            # (Cin, 4, Cout)
            weights.append(wt.reshape(cin * 4, cout).T)  # (Cout, Cin*4)
    return jnp.stack(patches, axis=0), jnp.stack(weights, axis=0)
    # TODO(synk): fold this 4-tap gather into the matmul kernel (shifted VMEM
    # slices of the padded input) to eliminate the materialized im2col tensor.


# --------------------------------------------------------------------------
# Tile planning (generation-aware)
# --------------------------------------------------------------------------

def _plan_tiles(cpad, kdim, m, vmem_limit):
    """Pick (k_pad, tk, tm, single_k, resident_w) within the VMEM budget."""
    budget = int(0.8 * vmem_limit)
    m_cap = max(128, _round_up(m, 128))

    def footprint(tm, k_resident, tk, with_scratch):
        b = 2 * cpad * k_resident * 2      # weights, bf16, double-buffered
        b += 2 * tk * tm * 2               # patch tile, bf16
        b += 2 * cpad * tm * 2             # y tile, bf16
        b += 4 * cpad * 4 * 2              # stats tiles (tiny)
        if with_scratch:
            b += cpad * tm * 4             # f32 accumulator
        return b

    k_pad = _round_up(kdim, 128)           # lane-aligned K (full MXU cadence)
    single_k = footprint(128, k_pad, k_pad, False) <= budget
    if single_k:
        tk = k_pad
        resident_w = True
        scratch = False
    else:
        tk = 512
        k_pad = _round_up(kdim, tk)
        scratch = True
        resident_w = footprint(128, k_pad, tk, True) <= budget

    k_res = k_pad if resident_w else tk
    tm = 128
    for cand in (256, 512, 1024, 2048):
        if cand <= m_cap and footprint(cand, k_res, tk, scratch) <= budget:
            tm = cand
    return k_pad, tk, tm, single_k, resident_w


# --------------------------------------------------------------------------
# Forward pass
# --------------------------------------------------------------------------

def unet_up(x, skip, w, gamma, beta):
    """relu(batchnorm(conv_transpose2d(x))) concatenated with skip (NCHW)."""
    n, cin, h, wd = x.shape
    cout = w.shape[1]
    ho, wo = 2 * h, 2 * wd
    m = n * h * wd                      # output pixels per phase
    kdim = cin * 4                      # contraction size per phase (no zeros)
    cpad = _round_up(cout, 128)         # lane/MXU-friendly channel padding

    vmem_cap = _vmem_capacity_bytes()
    # 64 MiB scoped limit on 128 MiB parts (v5e/v6e), 48 MiB on 64 MiB v7x.
    vmem_limit = min(3 * vmem_cap // 4, 64 * 1024 * 1024)

    k_pad, tk, tm, single_k, resident_w = _plan_tiles(cpad, kdim, m, vmem_limit)
    m_pad = _round_up(m, tm)
    nm = m_pad // tm
    nk = k_pad // tk

    # bf16 before decomposition -> the 16x-expanded prep intermediates are
    # built directly at half width (no later full-tensor cast pass).
    patches_t, weights_t = _phase_decompose(
        x.astype(jnp.bfloat16), w.astype(jnp.bfloat16))
    patches_t = jnp.pad(patches_t, ((0, 0), (0, k_pad - kdim), (0, m_pad - m)))
    weights_t = jnp.pad(weights_t, ((0, 0), (0, cpad - cout), (0, k_pad - kdim)))

    out_shape = (
        jax.ShapeDtypeStruct((4, cpad, m_pad), jnp.bfloat16),   # y (bf16!)
        jax.ShapeDtypeStruct((4, nm, cpad, 1), jnp.float32),    # partial sums
        jax.ShapeDtypeStruct((4, nm, cpad, 1), jnp.float32),    # partial ssq
    )

    if single_k:
        kernel = convt_stats_kernel_1k
        grid_spec = pltpu.PrefetchScalarGridSpec(
            num_scalar_prefetch=0,
            grid=(4, nm),
            in_specs=[
                # Per-phase weights: index constant across i -> resident,
                # DMA'd once per phase.
                pl.BlockSpec((None, cpad, k_pad), lambda p, i: (p, 0, 0)),
                pl.BlockSpec((None, k_pad, tm), lambda p, i: (p, 0, i)),
            ],
            out_specs=[
                pl.BlockSpec((None, cpad, tm), lambda p, i: (p, 0, i)),
                pl.BlockSpec((None, None, cpad, 1), lambda p, i: (p, i, 0, 0)),
                pl.BlockSpec((None, None, cpad, 1), lambda p, i: (p, i, 0, 0)),
            ],
        )
        dims = ("parallel", "parallel")
    else:
        kernel = functools.partial(convt_stats_kernel_mk, tk, resident_w)
        if resident_w:
            w_spec = pl.BlockSpec((None, cpad, k_pad), lambda p, i, k: (p, 0, 0))
        else:
            w_spec = pl.BlockSpec((None, cpad, tk), lambda p, i, k: (p, 0, k))
        grid_spec = pltpu.PrefetchScalarGridSpec(
            num_scalar_prefetch=0,
            grid=(4, nm, nk),
            in_specs=[
                w_spec,
                pl.BlockSpec((None, tk, tm), lambda p, i, k: (p, k, i)),
            ],
            out_specs=[
                pl.BlockSpec((None, cpad, tm), lambda p, i, k: (p, 0, i)),
                pl.BlockSpec((None, None, cpad, 1),
                             lambda p, i, k: (p, i, 0, 0)),
                pl.BlockSpec((None, None, cpad, 1),
                             lambda p, i, k: (p, i, 0, 0)),
            ],
            scratch_shapes=[pltpu.VMEM((cpad, tm), jnp.float32)],
        )
        dims = ("parallel", "parallel", "arbitrary")

    y, sums, ssqs = pl.pallas_call(
        kernel,
        grid_spec=grid_spec,
        out_shape=out_shape,
        compiler_params=pltpu.CompilerParams(
            dimension_semantics=dims,
            vmem_limit_bytes=vmem_limit,
        ),
    )(weights_t, patches_t)

    # ---- finalize BatchNorm statistics (training mode: biased variance). ----
    # Padded K rows / M columns are exact zeros, so they do not perturb the
    # sums; `count` uses the real element count N*Ho*Wo = 4*m.
    count = 4.0 * m
    tot_s = jnp.sum(sums, axis=(0, 1))[:, 0]          # (Cpad,)
    tot_q = jnp.sum(ssqs, axis=(0, 1))[:, 0]
    mean = tot_s / count
    var = jnp.maximum(tot_q / count - mean * mean, 0.0)
    gamma_p = jnp.pad(gamma.astype(jnp.float32), (0, cpad - cout))
    beta_p = jnp.pad(beta.astype(jnp.float32), (0, cpad - cout))
    scale = gamma_p * jax.lax.rsqrt(var + BN_EPS)      # single per-channel scale
    shift = beta_p - mean * scale                      # and shift (one FMA/elt)

    # ---- epilogue: affine + ReLU fused by XLA into the phase -> NCHW
    # re-interleave (oh = 2a + r, ow = 2b + c). ----
    up = y[:, :cout, :m].astype(jnp.float32)                      # (4, Cout, M)
    up = jnp.maximum(up * scale[None, :cout, None]
                     + shift[None, :cout, None], 0.0)
    up = up.reshape(2, 2, cout, n, h, wd)                         # (r,c,co,n,a,b)
    up = up.transpose(3, 2, 4, 0, 5, 1).reshape(n, cout, ho, wo)  # NCHW
    # TODO(synk): fold the affine+ReLU, phase->NCHW re-interleave and the skip
    # concat into a Pallas epilogue kernel (strided stores into a preallocated
    # (N, 2*Cout, Ho, Wo) buffer) to remove ~2 more HBM passes.
    # TODO(synk): dropout > 0 path (nn.Dropout) not implemented; the module's
    # default dropout=0.0 is a no-op.
    return jnp.concatenate([up.astype(skip.dtype), skip], axis=1)


# --------------------------------------------------------------------------
# Reference & test
# --------------------------------------------------------------------------

def reference(x, skip, w, gamma, beta):
    """Pure-JAX (f32) reference for the same forward pass."""
    rhs = jnp.transpose(w, (1, 0, 2, 3))[:, :, ::-1, ::-1]  # (Cout, Cin, 4, 4)
    y = jax.lax.conv_general_dilated(
        x, rhs, window_strides=(1, 1), padding=((2, 2), (2, 2)),
        lhs_dilation=(2, 2), dimension_numbers=("NCHW", "OIHW", "NCHW"))
    mean = y.mean(axis=(0, 2, 3), keepdims=True)
    var = ((y - mean) ** 2).mean(axis=(0, 2, 3), keepdims=True)
    yh = (y - mean) * jax.lax.rsqrt(var + BN_EPS)
    yh = yh * gamma.reshape(1, -1, 1, 1) + beta.reshape(1, -1, 1, 1)
    yh = jnp.maximum(yh, 0.0)
    return jnp.concatenate([yh, skip], axis=1)


if __name__ == "__main__":
    key = jax.random.PRNGKey(0)
    k1, k2, k3, k4, k5 = jax.random.split(key, 5)

    N, Cin, Cout, H, W = 2, 4, 4, 8, 8          # output spatial = 16x16
    x = jax.random.normal(k1, (N, Cin, H, W), jnp.float32)
    skip = jax.random.normal(k2, (N, Cout, 2 * H, 2 * W), jnp.float32)
    w = jax.random.normal(k3, (Cin, Cout, 4, 4), jnp.float32) * 0.1
    gamma = jax.random.uniform(k4, (Cout,), jnp.float32, minval=0.5, maxval=1.5)
    beta = jax.random.normal(k5, (Cout,), jnp.float32) * 0.1

    out = jax.jit(unet_up)(x, skip, w, gamma, beta)
    out = jax.block_until_ready(out)

    assert out.shape == (N, 2 * Cout, 2 * H, 2 * W), out.shape
    ref = reference(x, skip, w, gamma, beta)
    max_err = float(jnp.max(jnp.abs(out - ref)))
    # bf16 MXU operands + bf16 y writeback vs f32 reference -> relaxed
    # tolerance (~1e-2 relative error on the normalized output is expected).
    assert jnp.allclose(out, ref, atol=5e-2, rtol=5e-2), max_err

    print("KERNEL_OK")
</pallas_src>

<mosaic_0001>
module attributes {stable_mosaic.version = 11 : i64} {
  func.func @convt_stats_kernel_1k(%arg0: i32, %arg1: i32, %arg2: memref<1x128x128xbf16, #tpu.memory_space<vmem>>, %arg3: memref<1x128x128xbf16, #tpu.memory_space<vmem>>, %arg4: memref<1x128x128xbf16, #tpu.memory_space<vmem>>, %arg5: memref<1x1x128x1xf32, #tpu.memory_space<vmem>>, %arg6: memref<1x1x128x1xf32, #tpu.memory_space<vmem>>) attributes {dimension_semantics = [#tpu.dimension_semantics<parallel>, #tpu.dimension_semantics<parallel>], iteration_bounds = array<i64: 4, 1>, scalar_prefetch = 0 : i64, scratch_operands = 0 : i64, tpu.core_type = #tpu.core_type<tc>, window_params = [{transform_indices = @transform_0, window_bounds = array<i64: 1, 128, 128>}, {transform_indices = @transform_1, window_bounds = array<i64: 1, 128, 128>}, {transform_indices = @transform_2, window_bounds = array<i64: 1, 128, 128>}, {transform_indices = @transform_3, window_bounds = array<i64: 1, 1, 128, 1>}, {transform_indices = @transform_4, window_bounds = array<i64: 1, 1, 128, 1>}]} {
    %c0 = arith.constant 0 : index
    %c0_0 = arith.constant 0 : index
    %c0_1 = arith.constant 0 : index
    %0 = vector.load %arg2[%c0, %c0_0, %c0_1] : memref<1x128x128xbf16, #tpu.memory_space<vmem>>, vector<1x128x128xbf16>
    %1 = vector.shape_cast %0 : vector<1x128x128xbf16> to vector<128x128xbf16>
    %c0_2 = arith.constant 0 : index
    %c0_3 = arith.constant 0 : index
    %c0_4 = arith.constant 0 : index
    %2 = vector.load %arg3[%c0_2, %c0_3, %c0_4] : memref<1x128x128xbf16, #tpu.memory_space<vmem>>, vector<1x128x128xbf16>
    %3 = vector.shape_cast %2 : vector<1x128x128xbf16> to vector<128x128xbf16>
    %cst = arith.constant dense<0.000000e+00> : vector<128x128xf32>
    %4 = tpu.matmul %1, %3, %cst {dimension_numbers = #tpu.dot_dimension_numbers<[1], [0], [0], [1], [0, 0, 1, 1], [], []>} : vector<128x128xbf16>, vector<128x128xbf16>, vector<128x128xf32> -> vector<128x128xf32>
    %5 = arith.truncf %4 : vector<128x128xf32> to vector<128x128xbf16>
    %c0_5 = arith.constant 0 : index
    %c0_6 = arith.constant 0 : index
    %c0_7 = arith.constant 0 : index
    %6 = vector.load %arg4[%c0_5, %c0_6, %c0_7] : memref<1x128x128xbf16, #tpu.memory_space<vmem>>, vector<1x128x128xbf16>
    %7 = vector.shape_cast %6 : vector<1x128x128xbf16> to vector<128x128xbf16>
    %8 = vector.shape_cast %5 : vector<128x128xbf16> to vector<1x128x128xbf16>
    tpu.vector_store %arg4[%c0_5, %c0_6, %c0_7], %8 {strides = array<i32>} : memref<1x128x128xbf16, #tpu.memory_space<vmem>>, vector<1x128x128xbf16>,
    %cst_8 = arith.constant dense<0.000000e+00> : vector<128xf32>
    %9 = vector.multi_reduction <add>, %4, %cst_8 [1] : vector<128x128xf32> to vector<128xf32>
    %10 = vector.shape_cast %9 : vector<128xf32> to vector<128x1xf32>
    %c0_9 = arith.constant 0 : index
    %c0_10 = arith.constant 0 : index
    %c0_11 = arith.constant 0 : index
    %c0_12 = arith.constant 0 : index
    %11 = vector.load %arg5[%c0_9, %c0_10, %c0_11, %c0_12] : memref<1x1x128x1xf32, #tpu.memory_space<vmem>>, vector<1x1x128x1xf32>
    %12 = vector.shape_cast %11 : vector<1x1x128x1xf32> to vector<128x1xf32>
    %13 = vector.shape_cast %10 : vector<128x1xf32> to vector<1x1x128x1xf32>
    tpu.vector_store %arg5[%c0_9, %c0_10, %c0_11, %c0_12], %13 {strides = array<i32>} : memref<1x1x128x1xf32, #tpu.memory_space<vmem>>, vector<1x1x128x1xf32>,
    %14 = arith.mulf %4, %4 : vector<128x128xf32>
    %cst_13 = arith.constant dense<0.000000e+00> : vector<128xf32>
    %15 = vector.multi_reduction <add>, %14, %cst_13 [1] : vector<128x128xf32> to vector<128xf32>
    %16 = vector.shape_cast %15 : vector<128xf32> to vector<128x1xf32>
    %c0_14 = arith.constant 0 : index
    %c0_15 = arith.constant 0 : index
    %c0_16 = arith.constant 0 : index
    %c0_17 = arith.constant 0 : index
    %17 = vector.load %arg6[%c0_14, %c0_15, %c0_16, %c0_17] : memref<1x1x128x1xf32, #tpu.memory_space<vmem>>, vector<1x1x128x1xf32>
    %18 = vector.shape_cast %17 : vector<1x1x128x1xf32> to vector<128x1xf32>
    %19 = vector.shape_cast %16 : vector<128x1xf32> to vector<1x1x128x1xf32>
    tpu.vector_store %arg6[%c0_14, %c0_15, %c0_16, %c0_17], %19 {strides = array<i32>} : memref<1x1x128x1xf32, #tpu.memory_space<vmem>>, vector<1x1x128x1xf32>,
    return
  }
  func.func @transform_0(%arg0: i32, %arg1: i32) -> (i32, i32, i32) {
    %c0_i32 = arith.constant 0 : i32
    %c0_i32_0 = arith.constant 0 : i32
    %c0_i32_1 = arith.constant 0 : i32
    return %arg0, %c0_i32, %c0_i32_0 : i32, i32, i32
  }
  func.func @transform_1(%arg0: i32, %arg1: i32) -> (i32, i32, i32) {
    %c0_i32 = arith.constant 0 : i32
    %c0_i32_0 = arith.constant 0 : i32
    return %arg0, %c0_i32, %arg1 : i32, i32, i32
  }
  func.func @transform_2(%arg0: i32, %arg1: i32) -> (i32, i32, i32) {
    %c0_i32 = arith.constant 0 : i32
    %c0_i32_0 = arith.constant 0 : i32
    return %arg0, %c0_i32, %arg1 : i32, i32, i32
  }
  func.func @transform_3(%arg0: i32, %arg1: i32) -> (i32, i32, i32, i32) {
    %c0_i32 = arith.constant 0 : i32
    %c0_i32_0 = arith.constant 0 : i32
    %c0_i32_1 = arith.constant 0 : i32
    return %arg0, %arg1, %c0_i32, %c0_i32_0 : i32, i32, i32, i32
  }
  func.func @transform_4(%arg0: i32, %arg1: i32) -> (i32, i32, i32, i32) {
    %c0_i32 = arith.constant 0 : i32
    %c0_i32_0 = arith.constant 0 : i32
    %c0_i32_1 = arith.constant 0 : i32
    return %arg0, %arg1, %c0_i32, %c0_i32_0 : i32, i32, i32, i32
  }
}

</mosaic_0001>

<bundles_post_ra>
// kernel: unet_up.1
= control target key start
LH: loop header
LB: loop body
LE: loop exit
PB: predicated region body
PF: predicated region fallthrough
CT: control target
= control target key end

     0   :  { %s1063_s15 = smov 0   ;;  %s1065_s16 = smov 0   ;;  %s1202_s0 = inlined_call_operand.vmem [shape: bf16[4,128,128], index: 0, kind: input, shape index: {}]   ;;  %s1203_s1 = inlined_call_operand.vmem [shape: bf16[4,128,128], index: 1, kind: input, shape index: {}]   ;;  %s1204_s2 = inlined_call_operand.vmem [shape: bf16[4,128,128], index: 2, kind: output, shape index: {0}]   ;;  %s1205_s3 = inlined_call_operand.vmem [shape: f32[4,1,128,1], index: 3, kind: output, shape index: {1}]   ;;  %s1206_s4 = inlined_call_operand.vmem [shape: f32[4,1,128,1], index: 4, kind: output, shape index: {2}]  }
   0x1   :  { %s1067_s17 = smov 0  }
   0x2 LB: > { %s27_s18 = sadd.s32 1, %s1032_s16  ;;  %p821_p0 = scmp.ge.s32.totalorder %s1036_s17, 1  ;;  %s1036_s17 = sphi %s1067_s17, %s15_s17   ;;  %s1032_s16 = sphi %s1065_s16, %s1208_s16   ;;  %s1028_s15 = sphi %s1063_s15, %s1207_s15  }
   0x3   : > { %p29_p1 = scmp.ge.s32.totalorder %s27_s18, 4  ;;  %p200_p2 = scmp.lt.s32.totalorder %s1036_s17, 5 }
   0x5   : > { %s1210_s18 = smov (%p29_p1, %s27_s18), 0  ;;  %p201_p3 = pnand %p821_p0, %p200_p2 }
   0x6   : > { %p255_p4 = scmp.lt.s32.totalorder (!%p201_p3), %s1028_s15, 3 }
   0x7   : > { %204 = sbr.rel (%p201_p3) target bundleno = 372 (0x174), region = 28 }
   0xc   : > { %s1212_s15 = smov (!%p255_p4, %s1028_s15), 3  ;;  %vm535_vm0 = vcmask 7168  }
   0xd   : > { %s1084_s19 = sshll.u32 %s1212_s15, 6  ;;  %s901_s29 = sshll.u32 %s1212_s15, 7 }
   0xe   : > { %s1090_s22 = scalar_lea.vmem %s1203_s1, %s1084_s19  ;;  %s259_s25 = scalar_lea.vmem %s1202_s0, %s1084_s19 }
   0xf   : > { %v918_v0 = vld [vmem:[%s1090_s22 + $0x38] sm:$0xff]  ;;  %v917_v1 = vld [vmem:[%s1090_s22 + $0x30] sm:$0xff]  ;;  %v916_v2 = vld [vmem:[%s1090_s22 + $0x28] sm:$0xff]  ;;  %s1108_s28 = scalar_lea.vmem %s1204_s2, %s1084_s19  ;;  %s1122_s6 = scalar_lea.vmem %s1205_s3, %s901_s29 }
  0x10   : > { %422 = vmatpush.bf16.msra.mxu0 %v918_v0  ;;  %966 = vmatpush.bf16.msra.mxu1 %v918_v0  ;;  %v915_v3 = vld [vmem:[%s1090_s22 + $0x20] sm:$0xff]  ;;  %v914_v4 = vld [vmem:[%s1090_s22 + $0x18] sm:$0xff]  ;;  %v913_v5 = vld [vmem:[%s1090_s22 + $0x10] sm:$0xff]  ;;  %s1127_s9 = scalar_lea.vmem %s1206_s4, %s901_s29 }
  0x11   : > { %968 = vmatpush.bf16.msra.mxu3 %v918_v0  ;;  %967 = vmatpush.bf16.msra.mxu2 %v918_v0  ;;  %v912_v6 = vld [vmem:[%s1090_s22 + $0x8] sm:$0xff]  ;;  %v911_v7 = vld [vmem:[%s1090_s22] sm:$0xff]  ;;  %v905_v9 = vld [vmem:[%s259_s25 + $0x10] sm:$0xff] }
  0x12   : > { %v903_v8 = vld [vmem:[%s259_s25] sm:$0xff]  ;;  %v909_v10 = vld [vmem:[%s259_s25 + $0x30] sm:$0xff]  ;;  %v904_v12 = vld [vmem:[%s259_s25 + $0x8] sm:$0xff] }
  0x13   : > { %v907_v11 = vld [vmem:[%s259_s25 + $0x20] sm:$0xff]  ;;  %v906_v13 = vld [vmem:[%s259_s25 + $0x18] sm:$0xff]  ;;  %v908_v15 = vld [vmem:[%s259_s25 + $0x28] sm:$0xff] }
  0x14   : > { %423 = vmatpush.bf16.msra.mxu0 %v917_v1  ;;  %969 = vmatpush.bf16.msra.mxu1 %v917_v1  ;;  %v910_v14 = vld [vmem:[%s259_s25 + $0x38] sm:$0xff] }
  0x15   : > { %971 = vmatpush.bf16.msra.mxu3 %v917_v1  ;;  %970 = vmatpush.bf16.msra.mxu2 %v917_v1 }
  0x18   : > { %424 = vmatpush.bf16.msra.mxu0 %v916_v2  ;;  %972 = vmatpush.bf16.msra.mxu1 %v916_v2 }
  0x19   : > { %974 = vmatpush.bf16.msra.mxu3 %v916_v2  ;;  %973 = vmatpush.bf16.msra.mxu2 %v916_v2 }
  0x1c   : > { %425 = vmatpush.bf16.msra.mxu0 %v915_v3  ;;  %975 = vmatpush.bf16.msra.mxu1 %v915_v3 }
  0x1d   : > { %977 = vmatpush.bf16.msra.mxu3 %v915_v3  ;;  %976 = vmatpush.bf16.msra.mxu2 %v915_v3 }
  0x20   : > { %426 = vmatpush.bf16.msra.mxu0 %v914_v4  ;;  %978 = vmatpush.bf16.msra.mxu1 %v914_v4 }
  0x21   : > { %980 = vmatpush.bf16.msra.mxu3 %v914_v4  ;;  %979 = vmatpush.bf16.msra.mxu2 %v914_v4 }
  0x24   : > { %427 = vmatpush.bf16.msra.mxu0 %v913_v5  ;;  %981 = vmatpush.bf16.msra.mxu1 %v913_v5 }
  0x25   : > { %983 = vmatpush.bf16.msra.mxu3 %v913_v5  ;;  %982 = vmatpush.bf16.msra.mxu2 %v913_v5 }
  0x28   : > { %428 = vmatpush.bf16.msra.mxu0 %v912_v6  ;;  %984 = vmatpush.bf16.msra.mxu1 %v912_v6 }
  0x29   : > { %986 = vmatpush.bf16.msra.mxu3 %v912_v6  ;;  %985 = vmatpush.bf16.msra.mxu2 %v912_v6 }
  0x2c   : > { %429 = vmatpush.bf16.msra.mxu0 %v911_v7  ;;  %987 = vmatpush.bf16.msra.mxu1 %v911_v7 }
  0x2d   : > { %989 = vmatpush.bf16.msra.mxu3 %v911_v7  ;;  %988 = vmatpush.bf16.msra.mxu2 %v911_v7 }
  0x2f   : > { %430 = vmatmul.bf16.vlgmr.msra.gmra.mxu0 %v903_v8  ;;  %440 = vmatmul.bf16.vlgmr.msra.gmra.mxu1 %v905_v9 }
  0x30   : > { %460 = vmatmul.bf16.vlgmr.msra.gmra.mxu3 %v909_v10  ;;  %450 = vmatmul.bf16.vlgmr.msra.gmra.mxu2 %v907_v11 }
  0x3f   : > { %435 = vmatmul.bf16.gmra.mxu0 %v904_v12  ;;  %445 = vmatmul.bf16.gmra.mxu1 %v906_v13 }
  0x40   : > { %465 = vmatmul.bf16.gmra.mxu3 %v910_v14  ;;  %455 = vmatmul.bf16.gmra.mxu2 %v908_v15 }
  0xac   : > { %v431_v16 = vpop.f32.mrf.mxu0  ;;  %v441_v17 = vpop.f32.mrf.mxu1 }
  0xad   : > { %511 = vadd.xlane.f32.xlu2 %v441_v17  ;;  %503 = vadd.xlane.f32.xlu0 %v431_v16  ;;  %v552_v18 = vmul.f32 %v431_v16, %v431_v16  ;;  %v556_v19 = vmul.f32 %v441_v17, %v441_v17 }
  0xaf   : > { %568 = vadd.xlane.f32.xlu1 %v552_v18 }
  0xb3   : > { %v461_v20 = vpop.f32.mrf.mxu3  ;;  %v451_v21 = vpop.f32.mrf.mxu2 }
  0xb4   : > { %v433_v22 = vpop.f32.mrf.mxu0  ;;  %v443_v23 = vpop.f32.mrf.mxu1  ;;  %v564_v24 = vmul.f32 %v461_v20, %v461_v20  ;;  %v560_v33 = vmul.f32 %v451_v21, %v451_v21 }
  0xb5   : > { %v922_v25 = vpack.c.bf16 %v433_v22, %v431_v16  ;;  %576 = vadd.xlane.f32.xlu2 %v556_v19  ;;  %527 = vadd.xlane.f32.xlu0 %v461_v20  ;;  %v932_v26 = vpack.c.bf16 %v443_v23, %v441_v17  ;;  %v557_v40 = vmul.f32 %v443_v23, %v443_v23 }
  0xb6   : > { %v553_v41 = vmul.f32 %v433_v22, %v433_v22 }
  0xb7   : > { %923 = vst [vmem:[%s1108_s28] sm:$0xff] %v922_v25   ;;  %592 = vadd.xlane.f32.xlu1 %v564_v24 }
  0xb8   : > { %960 = vst [vmem:[%s1108_s28 + $0x10] sm:$0xff] %v932_v26  }
  0xbb   : > { %v463_v27 = vpop.f32.mrf.mxu3  ;;  %v453_v28 = vpop.f32.mrf.mxu2 }
  0xbc   : > { %v952_v29 = vpack.c.bf16 %v463_v27, %v461_v20  ;;  %v436_v30 = vpop.f32.mrf.mxu0  ;;  %v942_v31 = vpack.c.bf16 %v453_v28, %v451_v21  ;;  %v446_v32 = vpop.f32.mrf.mxu1  ;;  %v561_v46 = vmul.f32 %v453_v28, %v453_v28  ;;  %v565_v51 = vmul.f32 %v463_v27, %v463_v27 }
  0xbd   : > { %519 = vadd.xlane.f32.xlu2 %v451_v21  ;;  %505 = vadd.xlane.f32.xlu0 %v433_v22  ;;  %v558_v47 = vmul.f32 %v446_v32, %v446_v32  ;;  %v554_v50 = vmul.f32 %v436_v30, %v436_v30 }
  0xbe   : > { %964 = vst [vmem:[%s1108_s28 + $0x30] sm:$0xff] %v952_v29  }
  0xbf   : > { %529 = vadd.xlane.f32.xlu1 %v463_v27  ;;  %962 = vst [vmem:[%s1108_s28 + $0x20] sm:$0xff] %v942_v31  }
  0xc3   : > { %v466_v34 = vpop.f32.mrf.mxu3  ;;  %v456_v35 = vpop.f32.mrf.mxu2 }
  0xc4   : > { %v438_v36 = vpop.f32.mrf.mxu0  ;;  %v448_v37 = vpop.f32.mrf.mxu1  ;;  %v562_v48 = vmul.f32 %v456_v35, %v456_v35  ;;  %v566_v54 = vmul.f32 %v466_v34, %v466_v34 }
  0xc5   : > { %513 = vadd.xlane.f32.xlu2 %v443_v23  ;;  %584 = vadd.xlane.f32.xlu0 %v560_v33  ;;  %v927_v38 = vpack.c.bf16 %v438_v36, %v436_v30  ;;  %v937_v39 = vpack.c.bf16 %v448_v37, %v446_v32  ;;  %v559_v49 = vmul.f32 %v448_v37, %v448_v37 }
  0xc6   : > { %v555_v53 = vmul.f32 %v438_v36, %v438_v36 }
  0xc7   : > { %959 = vst [vmem:[%s1108_s28 + $0x8] sm:$0xff] %v927_v38   ;;  %507 = vadd.xlane.f32.xlu1 %v436_v30 }
  0xc8   : > { %961 = vst [vmem:[%s1108_s28 + $0x18] sm:$0xff] %v937_v39  }
  0xcb   : > { %v458_v42 = vpop.f32.mrf.mxu2  ;;  %v468_v43 = vpop.f32.mrf.mxu3 }
  0xcc   : > { %v947_v44 = vpack.c.bf16 %v458_v42, %v456_v35  ;;  %v957_v45 = vpack.c.bf16 %v468_v43, %v466_v34  ;;  %v563_v52 = vmul.f32 %v458_v42, %v458_v42  ;;  %v567_v55 = vmul.f32 %v468_v43, %v468_v43 }
  0xcd   : > { %578 = vadd.xlane.f32.xlu0 %v557_v40  ;;  %570 = vadd.xlane.f32.xlu2 %v553_v41 }
  0xce   : > { %963 = vst [vmem:[%s1108_s28 + $0x28] sm:$0xff] %v947_v44  }
  0xcf   : > { %586 = vadd.xlane.f32.xlu1 %v561_v46  ;;  %965 = vst [vmem:[%s1108_s28 + $0x38] sm:$0xff] %v957_v45  }
  0xd5   : > { %521 = vadd.xlane.f32.xlu0 %v453_v28  ;;  %531 = vadd.xlane.f32.xlu2 %v466_v34 }
  0xd7   : > { %580 = vadd.xlane.f32.xlu1 %v558_v47 }
  0xdd   : > { %515 = vadd.xlane.f32.xlu0 %v446_v32  ;;  %588 = vadd.xlane.f32.xlu2 %v562_v48 }
  0xdf   : > { %523 = vadd.xlane.f32.xlu1 %v456_v35 }
  0xe5   : > { %582 = vadd.xlane.f32.xlu2 %v559_v49  ;;  %572 = vadd.xlane.f32.xlu0 %v554_v50 }
  0xe7   : > { %509 = vadd.xlane.f32.xlu1 %v438_v36 }
  0xed   : > { %525 = vadd.xlane.f32.xlu2 %v458_v42  ;;  %533 = vadd.xlane.f32.xlu0 %v468_v43 }
  0xef   : > { %517 = vadd.xlane.f32.xlu1 %v448_v37 }
  0xf5   : > { %594 = vadd.xlane.f32.xlu2 %v565_v51  ;;  %590 = vadd.xlane.f32.xlu0 %v563_v52 }
  0xf7   : > { %574 = vadd.xlane.f32.xlu1 %v555_v53 }
  0xfd   : > { %596 = vadd.xlane.f32.xlu0 %v566_v54 }
  0xff   : > { %598 = vadd.xlane.f32.xlu1 %v567_v55 }
 0x120   : > { %v512_v56 = vpop.xlane.xlu2 %511  ;;  %v504_v57 = vpop.xlane.xlu0 %503 }
 0x121   : > { %540 = vst.msk [vmem:[%s1122_s6 + $0x20] sm:$0xff] %vm535_vm0, %v512_v56 }
 0x122   : > { %536 = vst.msk [vmem:[%s1122_s6] sm:$0xff] %vm535_vm0, %v504_v57  ;;  %v569_v58 = vpop.xlane.xlu1 %568 }
 0x123   : > { %600 = vst.msk [vmem:[%s1127_s9] sm:$0xff] %vm535_vm0, %v569_v58 }
 0x128   : > { %v577_v59 = vpop.xlane.xlu2 %576  ;;  %v528_v60 = vpop.xlane.xlu0 %527 }
 0x129   : > { %604 = vst.msk [vmem:[%s1127_s9 + $0x20] sm:$0xff] %vm535_vm0, %v577_v59 }
 0x12a   : > { %548 = vst.msk [vmem:[%s1122_s6 + $0x60] sm:$0xff] %vm535_vm0, %v528_v60  ;;  %v593_v61 = vpop.xlane.xlu1 %592 }
 0x12b   : > { %612 = vst.msk [vmem:[%s1127_s9 + $0x60] sm:$0xff] %vm535_vm0, %v593_v61 }
 0x130   : > { %v520_v62 = vpop.xlane.xlu2 %519  ;;  %v506_v63 = vpop.xlane.xlu0 %505 }
 0x131   : > { %544 = vst.msk [vmem:[%s1122_s6 + $0x40] sm:$0xff] %vm535_vm0, %v520_v62 }
 0x132   : > { %537 = vst.msk [vmem:[%s1122_s6 + $0x8] sm:$0xff] %vm535_vm0, %v506_v63  ;;  %v530_v0 = vpop.xlane.xlu1 %529 }
 0x133   : > { %549 = vst.msk [vmem:[%s1122_s6 + $0x68] sm:$0xff] %vm535_vm0, %v530_v0 }
 0x138   : > { %v514_v1 = vpop.xlane.xlu2 %513  ;;  %v585_v2 = vpop.xlane.xlu0 %584 }
 0x139   : > { %541 = vst.msk [vmem:[%s1122_s6 + $0x28] sm:$0xff] %vm535_vm0, %v514_v1 }
 0x13a   : > { %608 = vst.msk [vmem:[%s1127_s9 + $0x40] sm:$0xff] %vm535_vm0, %v585_v2  ;;  %v508_v3 = vpop.xlane.xlu1 %507 }
 0x13b   : > { %538 = vst.msk [vmem:[%s1122_s6 + $0x10] sm:$0xff] %vm535_vm0, %v508_v3 }
 0x140   : > { %v579_v4 = vpop.xlane.xlu0 %578  ;;  %v571_v5 = vpop.xlane.xlu2 %570 }
 0x141   : > { %605 = vst.msk [vmem:[%s1127_s9 + $0x28] sm:$0xff] %vm535_vm0, %v579_v4 }
 0x142   : > { %601 = vst.msk [vmem:[%s1127_s9 + $0x8] sm:$0xff] %vm535_vm0, %v571_v5  ;;  %v587_v6 = vpop.xlane.xlu1 %586 }
 0x143   : > { %609 = vst.msk [vmem:[%s1127_s9 + $0x48] sm:$0xff] %vm535_vm0, %v587_v6 }
 0x148   : > { %v522_v7 = vpop.xlane.xlu0 %521  ;;  %v532_v8 = vpop.xlane.xlu2 %531 }
 0x149   : > { %545 = vst.msk [vmem:[%s1122_s6 + $0x48] sm:$0xff] %vm535_vm0, %v522_v7 }
 0x14a   : > { %550 = vst.msk [vmem:[%s1122_s6 + $0x70] sm:$0xff] %vm535_vm0, %v532_v8  ;;  %v581_v9 = vpop.xlane.xlu1 %580 }
 0x14b   : > { %606 = vst.msk [vmem:[%s1127_s9 + $0x30] sm:$0xff] %vm535_vm0, %v581_v9 }
 0x150   : > { %v516_v10 = vpop.xlane.xlu0 %515  ;;  %v589_v11 = vpop.xlane.xlu2 %588 }
 0x151   : > { %542 = vst.msk [vmem:[%s1122_s6 + $0x30] sm:$0xff] %vm535_vm0, %v516_v10 }
 0x152   : > { %610 = vst.msk [vmem:[%s1127_s9 + $0x50] sm:$0xff] %vm535_vm0, %v589_v11  ;;  %v524_v12 = vpop.xlane.xlu1 %523 }
 0x153   : > { %546 = vst.msk [vmem:[%s1122_s6 + $0x50] sm:$0xff] %vm535_vm0, %v524_v12 }
 0x158   : > { %v583_v13 = vpop.xlane.xlu2 %582  ;;  %v573_v14 = vpop.xlane.xlu0 %572 }
 0x159   : > { %607 = vst.msk [vmem:[%s1127_s9 + $0x38] sm:$0xff] %vm535_vm0, %v583_v13 }
 0x15a   : > { %602 = vst.msk [vmem:[%s1127_s9 + $0x10] sm:$0xff] %vm535_vm0, %v573_v14  ;;  %v510_v15 = vpop.xlane.xlu1 %509 }
 0x15b   : > { %539 = vst.msk [vmem:[%s1122_s6 + $0x18] sm:$0xff] %vm535_vm0, %v510_v15 }
 0x160   : > { %v526_v16 = vpop.xlane.xlu2 %525  ;;  %v534_v17 = vpop.xlane.xlu0 %533 }
 0x161   : > { %547 = vst.msk [vmem:[%s1122_s6 + $0x58] sm:$0xff] %vm535_vm0, %v526_v16 }
 0x162   : > { %551 = vst.msk [vmem:[%s1122_s6 + $0x78] sm:$0xff] %vm535_vm0, %v534_v17  ;;  %v518_v18 = vpop.xlane.xlu1 %517 }
 0x163   : > { %543 = vst.msk [vmem:[%s1122_s6 + $0x38] sm:$0xff] %vm535_vm0, %v518_v18 }
 0x168   : > { %v595_v19 = vpop.xlane.xlu2 %594  ;;  %v591_v20 = vpop.xlane.xlu0 %590 }
 0x169   : > { %613 = vst.msk [vmem:[%s1127_s9 + $0x68] sm:$0xff] %vm535_vm0, %v595_v19 }
 0x16a   : > { %611 = vst.msk [vmem:[%s1127_s9 + $0x58] sm:$0xff] %vm535_vm0, %v591_v20  ;;  %v575_v21 = vpop.xlane.xlu1 %574 }
 0x16b   : > { %603 = vst.msk [vmem:[%s1127_s9 + $0x18] sm:$0xff] %vm535_vm0, %v575_v21 }
 0x170   : > { %v597_v22 = vpop.xlane.xlu0 %596 }
 0x171   : > { %614 = vst.msk [vmem:[%s1127_s9 + $0x70] sm:$0xff] %vm535_vm0, %v597_v22 }
 0x172   : > { %v599_v23 = vpop.xlane.xlu1 %598 }
 0x173   : > { %615 = vst.msk [vmem:[%s1127_s9 + $0x78] sm:$0xff] %vm535_vm0, %v599_v23 }
 0x174 PF: > { %s15_s17 = sadd.s32 1, %s1036_s17   ;;  %s1207_s15 = smov %s1032_s16 }
 0x175   : > { %p12_p5 = scmp.ge.s32.totalorder %s15_s17, 6   ;;  %s1208_s16 = smov %s1210_s18 }
 0x177   :  { %14 = sbr.rel (!%p12_p5) target bundleno = 2 (0x2), region = 85 }

</bundles_post_ra>
